<compile_context>
chip_gen: v7x
topology: tpu7x:2x2x1
jax: 0.10.0
libtpu: 0.0.40
codegen_flags: <defaults>
</compile_context>

<pallas_src>
import functools

import jax
import jax.numpy as jnp
from jax import lax
from jax.experimental import pallas as pl
from jax.experimental.pallas import tpu as pltpu


# ----------------------------------------------------------------------------
# Tiling helpers
# ----------------------------------------------------------------------------
def _round_up(x, m):
    return (x + m - 1) // m * m


def _choose_k_tiling(cd, ab, feat_bytes):
    """Pick (cd_padded, tk, num_k) for the K (contraction) grid axis."""
    # Keep the double-buffered (ab, tk) feature block around ~8 MiB so it fits
    # the scoped VMEM budget on every chip generation (v5e/v6e/v7x).
    tk_budget = (8 * 1024 * 1024) // max(1, 2 * ab * feat_bytes)
    tk_max = max(128, min(2048, (tk_budget // 128) * 128))
    if cd <= tk_max:
        # Single K step; block == full array dim, so no 128-alignment needed
        # and no padding copy at all.
        return cd, cd, 1
    cd_p = _round_up(cd, 128)
    nk = cd_p // 128
    # Largest multiple of 128 that divides cd_p and is <= tk_max: avoids any
    # padding beyond 128-lane alignment (zero-padding columns is correct — they
    # contribute nothing to the Gram — but the pad copy costs HBM bandwidth).
    best = 1
    for div in range(1, tk_max // 128 + 1):
        if nk % div == 0:
            best = div
    tk = 128 * best
    return cd_p, tk, cd_p // tk


def _vmem_limit_bytes(ab, tk, feat_bytes, n_f32_blocks):
    # Double-buffered feature stream + f32 (ab, ab) blocks, with headroom.
    # Clamped to stay safely under v7x physical VMEM (64 MiB).
    est = 2 * ab * tk * feat_bytes + n_f32_blocks * ab * ab * 4 + (1 << 20)
    return int(min(max(int(est * 1.5), 32 * 1024 * 1024), 56 * 1024 * 1024))


# ----------------------------------------------------------------------------
# Kernels
# ----------------------------------------------------------------------------
def _gram_kernel(f_ref, g_ref, *, inv_denom):
    # f_ref: (ab, tk) K-chunk of features (native dtype); g_ref: (ab, ab) f32.
    # g_ref has a constant block index across the K axis, so it stays resident
    # in VMEM and doubles as the accumulator (no extra scratch needed).
    k = pl.program_id(0)

    @pl.when(k == 0)
    def _():
        g_ref[...] = jnp.zeros_like(g_ref)

    f = f_ref[...]
    # Contract the last dim of both operands: F @ F.T with no materialized
    # transpose of F.
    g_ref[...] += lax.dot_general(
        f, f,
        dimension_numbers=(((1,), (1,)), ((), ())),
        preferred_element_type=jnp.float32,
    )

    @pl.when(k == pl.num_programs(0) - 1)
    def _():
        g_ref[...] = g_ref[...] * inv_denom


def _style_loss_kernel(f_ref, tgt_ref, loss_ref, acc_ref, *, inv_denom, inv_numel):
    # f_ref: (ab, tk); tgt_ref: (ab, ab) f32 precomputed target Gram;
    # loss_ref: (1, 1) f32; acc_ref: (ab, ab) f32 scratch accumulator.
    k = pl.program_id(0)

    @pl.when(k == 0)
    def _():
        acc_ref[...] = jnp.zeros_like(acc_ref)

    f = f_ref[...]
    acc_ref[...] += lax.dot_general(
        f, f,
        dimension_numbers=(((1,), (1,)), ((), ())),
        preferred_element_type=jnp.float32,
    )

    @pl.when(k == pl.num_programs(0) - 1)
    def _():
        diff = acc_ref[...] * inv_denom - tgt_ref[...]
        # mean reduction of MSELoss: sum of squares * 1/(ab*ab), kept as (1,1).
        loss_ref[...] = jnp.sum(diff * diff, keepdims=True) * inv_numel


# ----------------------------------------------------------------------------
# Wrappers
# ----------------------------------------------------------------------------
def _prep_features(x):
    a, b, c, d = x.shape
    ab, cd = a * b, c * d
    denom = float(a * b * c * d)
    feats = x.reshape(ab, cd)  # keep native dtype; MXU accumulates in f32
    feat_bytes = jnp.dtype(feats.dtype).itemsize
    cd_p, tk, num_k = _choose_k_tiling(cd, ab, feat_bytes)
    if cd_p != cd:
        # Zero columns contribute nothing to F @ F.T, so the Gram is unchanged.
        feats = jnp.pad(feats, ((0, 0), (0, cd_p - cd)))
    return feats, ab, cd_p, tk, num_k, denom, feat_bytes


def gram_matrix(x):
    """x: (a, b, c, d) feature map -> (a*b, a*b) f32 Gram / (a*b*c*d)."""
    feats, ab, cd_p, tk, num_k, denom, feat_bytes = _prep_features(x)

    grid_spec = pltpu.PrefetchScalarGridSpec(
        num_scalar_prefetch=0,
        grid=(num_k,),
        in_specs=[pl.BlockSpec((ab, tk), lambda k: (0, k))],
        out_specs=pl.BlockSpec((ab, ab), lambda k: (0, 0)),
        scratch_shapes=[],
    )
    cost = pl.CostEstimate(
        flops=2 * ab * ab * cd_p,
        transcendentals=0,
        bytes_accessed=ab * cd_p * feat_bytes + ab * ab * 4,
    )
    return pl.pallas_call(
        functools.partial(_gram_kernel, inv_denom=1.0 / denom),
        out_shape=jax.ShapeDtypeStruct((ab, ab), jnp.float32),
        grid_spec=grid_spec,
        compiler_params=pltpu.CompilerParams(
            dimension_semantics=("arbitrary",),
            vmem_limit_bytes=_vmem_limit_bytes(ab, tk, feat_bytes, 1),
        ),
        cost_estimate=cost,
    )(feats)


def style_loss_forward(x, target_gram):
    """Returns (x unchanged, scalar MSE(gram(x), target_gram))."""
    feats, ab, cd_p, tk, num_k, denom, feat_bytes = _prep_features(x)
    assert target_gram.shape == (ab, ab)

    grid_spec = pltpu.PrefetchScalarGridSpec(
        num_scalar_prefetch=0,
        grid=(num_k,),
        in_specs=[
            pl.BlockSpec((ab, tk), lambda k: (0, k)),
            pl.BlockSpec((ab, ab), lambda k: (0, 0)),
        ],
        out_specs=pl.BlockSpec((1, 1), lambda k: (0, 0)),
        scratch_shapes=[pltpu.VMEM((ab, ab), jnp.float32)],
    )
    cost = pl.CostEstimate(
        flops=2 * ab * ab * cd_p + 3 * ab * ab,
        transcendentals=0,
        bytes_accessed=ab * cd_p * feat_bytes + ab * ab * 4 + 4,
    )
    loss = pl.pallas_call(
        functools.partial(
            _style_loss_kernel,
            inv_denom=1.0 / denom,
            inv_numel=1.0 / float(ab * ab),
        ),
        out_shape=jax.ShapeDtypeStruct((1, 1), jnp.float32),
        grid_spec=grid_spec,
        compiler_params=pltpu.CompilerParams(
            dimension_semantics=("arbitrary",),
            vmem_limit_bytes=_vmem_limit_bytes(ab, tk, feat_bytes, 2),
        ),
        cost_estimate=cost,
    )(feats, target_gram.astype(jnp.float32))

    # nn.MSELoss default reduction='mean' -> scalar; identity passthrough.
    return x, loss[0, 0]


class StyleLoss:
    """JAX/Pallas port of the PyTorch StyleLoss module.

    __init__ stores the (detached) Gram matrix of the target feature map.
    __call__(input) computes gram(input), stores self.loss = MSE(G, target),
    and returns the input unchanged (identity passthrough).
    """

    def __init__(self, target_feature):
        self.target = jax.lax.stop_gradient(gram_matrix(target_feature))
        self.loss = None

    def __call__(self, x):
        out, loss = style_loss_forward(x, self.target)
        self.loss = loss
        return out


# ----------------------------------------------------------------------------
# Demo / smoke test
# ----------------------------------------------------------------------------
if __name__ == "__main__":
    key = jax.random.PRNGKey(0)
    k_target, k_input = jax.random.split(key)

    # Small shapes consistent with the module's NCHW conv-feature input.
    a, b, c, d = 2, 4, 16, 16
    target_feature = jax.random.normal(k_target, (a, b, c, d), dtype=jnp.float32)
    x = jax.random.normal(k_input, (a, b, c, d), dtype=jnp.float32)

    module = StyleLoss(target_feature)
    out = module(x)
    out = jax.block_until_ready(out)
    loss = jax.block_until_ready(module.loss)

    # Reference check in pure JAX (same math as the PyTorch module).
    def _gram_ref(t):
        f = t.reshape(a * b, c * d).astype(jnp.float32)
        return (f @ f.T) / (a * b * c * d)

    g_ref = _gram_ref(x)
    t_ref = _gram_ref(target_feature)
    loss_ref = jnp.mean((g_ref - t_ref) ** 2)

    assert out.shape == x.shape and jnp.allclose(out, x)
    assert jnp.allclose(module.target, t_ref, rtol=1e-5, atol=1e-6)
    assert jnp.allclose(loss, loss_ref, rtol=1e-5, atol=1e-6)

    print("KERNEL_OK")
</pallas_src>

<mosaic_0001>
module attributes {stable_mosaic.version = 11 : i64} {
  func.func @_gram_kernel(%arg0: i32, %arg1: memref<8x256xf32, #tpu.memory_space<vmem>>, %arg2: memref<8x8xf32, #tpu.memory_space<vmem>>) attributes {dimension_semantics = [#tpu.dimension_semantics<arbitrary>], iteration_bounds = array<i64: 1>, scalar_prefetch = 0 : i64, scratch_operands = 0 : i64, tpu.core_type = #tpu.core_type<tc>, window_params = [{transform_indices = @transform_0, window_bounds = array<i64: 8, 256>}, {pipeline_mode = #tpu.pipeline_mode<synchronous>, transform_indices = @transform_1, window_bounds = array<i64: 8, 8>}]} {
    %c0_i32 = arith.constant 0 : i32
    %0 = arith.cmpi eq, %arg0, %c0_i32 : i32
    %1 = arith.extui %0 : i1 to i32
    %c0_i32_0 = arith.constant 0 : i32
    %2 = arith.cmpi ne, %1, %c0_i32_0 : i32
    scf.if %2 {
      %cst_8 = arith.constant 0.000000e+00 : f32
      %11 = vector.broadcast %cst_8 : f32 to vector<8x8xf32>
      %c0_9 = arith.constant 0 : index
      %c0_10 = arith.constant 0 : index
      %12 = vector.load %arg2[%c0_9, %c0_10] : memref<8x8xf32, #tpu.memory_space<vmem>>, vector<8x8xf32>
      tpu.vector_store %arg2[%c0_9, %c0_10], %11 {strides = array<i32>} : memref<8x8xf32, #tpu.memory_space<vmem>>, vector<8x8xf32>,
    } else {
    }
    %c0 = arith.constant 0 : index
    %c0_1 = arith.constant 0 : index
    %3 = vector.load %arg1[%c0, %c0_1] : memref<8x256xf32, #tpu.memory_space<vmem>>, vector<8x256xf32>
    %c0_2 = arith.constant 0 : index
    %c0_3 = arith.constant 0 : index
    %4 = vector.load %arg2[%c0_2, %c0_3] : memref<8x8xf32, #tpu.memory_space<vmem>>, vector<8x8xf32>
    %cst = arith.constant dense<0.000000e+00> : vector<8x8xf32>
    %5 = tpu.matmul %3, %3, %cst {dimension_numbers = #tpu.dot_dimension_numbers<[1], [1], [0], [0], [0, 0, 1, 0], [], []>} : vector<8x256xf32>, vector<8x256xf32>, vector<8x8xf32> -> vector<8x8xf32>
    %6 = arith.addf %4, %5 : vector<8x8xf32>
    %c0_4 = arith.constant 0 : index
    %c0_5 = arith.constant 0 : index
    %7 = vector.load %arg2[%c0_4, %c0_5] : memref<8x8xf32, #tpu.memory_space<vmem>>, vector<8x8xf32>
    tpu.vector_store %arg2[%c0_4, %c0_5], %6 {strides = array<i32>} : memref<8x8xf32, #tpu.memory_space<vmem>>, vector<8x8xf32>,
    %c0_i32_6 = arith.constant 0 : i32
    %8 = arith.cmpi eq, %arg0, %c0_i32_6 : i32
    %9 = arith.extui %8 : i1 to i32
    %c0_i32_7 = arith.constant 0 : i32
    %10 = arith.cmpi ne, %9, %c0_i32_7 : i32
    scf.if %10 {
      %c0_8 = arith.constant 0 : index
      %c0_9 = arith.constant 0 : index
      %11 = vector.load %arg2[%c0_8, %c0_9] : memref<8x8xf32, #tpu.memory_space<vmem>>, vector<8x8xf32>
      %cst_10 = arith.constant 4.8828125E-4 : f32
      %12 = vector.broadcast %cst_10 : f32 to vector<8x8xf32>
      %13 = arith.mulf %11, %12 : vector<8x8xf32>
      %c0_11 = arith.constant 0 : index
      %c0_12 = arith.constant 0 : index
      %14 = vector.load %arg2[%c0_11, %c0_12] : memref<8x8xf32, #tpu.memory_space<vmem>>, vector<8x8xf32>
      tpu.vector_store %arg2[%c0_11, %c0_12], %13 {strides = array<i32>} : memref<8x8xf32, #tpu.memory_space<vmem>>, vector<8x8xf32>,
    } else {
    }
    return
  }
  func.func @transform_0(%arg0: i32) -> (i32, i32) {
    %c0_i32 = arith.constant 0 : i32
    %c0_i32_0 = arith.constant 0 : i32
    return %c0_i32, %arg0 : i32, i32
  }
  func.func @transform_1(%arg0: i32) -> (i32, i32) {
    %c0_i32 = arith.constant 0 : i32
    %c0_i32_0 = arith.constant 0 : i32
    %c0_i32_1 = arith.constant 0 : i32
    return %c0_i32, %c0_i32_0 : i32, i32
  }
}

</mosaic_0001>

<bundles_post_ra>
// kernel: tpu_custom_call.1
= control target key start
LH: loop header
LB: loop body
LE: loop exit
PB: predicated region body
PF: predicated region fallthrough
CT: control target
= control target key end

     0   :  { %6 = vsyncpa [#allocation3], 0  ;;  %s215_s0 = inlined_call_operand.hbm [shape: f32[8,256], index: 0, kind: input, shape index: {}]   ;;  %s216_s1 = inlined_call_operand.hbm [shape: f32[8,8], index: 1, kind: output, shape index: {}]  }
   0x1   :  { %7 = vsyncpa [#allocation4], 0  ;;  %s175_s6 = smov [#allocation2]   ;;  %s127_s10 = scalar_lea.hbm %s215_s0, 256 }
   0x2   :  { %s14_s7 = sshll.u32 %s175_s6, 4  ;;  %p128_p0 = scmp.ne.s32.totalorder %s215_s0, %s127_s10  ;;  %s15_s7 = int_to_ptr.vmem [resolvable:$true] %s14_s7 }
   0x3   :  { %p131_p1 = scmp.lt.u32.totalorder %s127_s10, %s215_s0 }
   0x5   :  { %p133_p2 = pnand %p131_p1, %p128_p0 }
   0x7   :  { %136 = shalt.err (!%p133_p2)
}
   0x8   :  { %s137_s15 = scalar_lea.vmem %s15_s7, 256  ;;  %p142_p4 = scmp.lt.s32.totalorder %s15_s7, %s15_s7 }
   0x9   :  { %p138_p3 = scmp.ne.s32.totalorder %s15_s7, %s137_s15  ;;  %p143_p5 = scmp.lt.s32.totalorder %s137_s15, %s137_s15 }
   0xb   :  { %p144_p6 = por %p143_p5, %p142_p4 }
   0xd   :  { %p145_p7 = pnand %p144_p6, %p138_p3 }
   0xf   :  { %148 = shalt.err (!%p145_p7)
}
  0x10   :  { %17 = dma.hbm_to_vmem [thread:$0]  %s215_s0, 256, %s15_s7, [#allocation3]  }
  0x11   :  { %171 = dma.done.wait [#allocation3], 256  }
  0x12   :  { %172 = vsyncadd [#allocation3], 4294967040  ;;  %vm25_vm0 = vcmask 64512   ;;  %v176_v0 = vmov 0.0   ;;  %v28_v1 = vld [vmem:[#allocation2 + $0x8] sm:$0xff]  ;;  %v27_v2 = vld [vmem:[#allocation2] sm:$0xff] }
  0x13   :  { %26 = vst.msk [vmem:[#allocation5] sm:$0xff] %vm25_vm0, %v176_v0  ;;  %30 = vmatprep.subr.mxu0 %v28_v1  ;;  %94 = vmatprep.mubr.f32.mxu0 %v28_v1  ;;  %s177_s18 = smov [#allocation5]  }
  0x14   :  { %31 = vmatpush1.xpose.msra.mxu0 %v27_v2  ;;  %s115_s0 = sshll.u32 %s177_s18, 4  ;;  %s116_s0 = int_to_ptr.vmem [resolvable:$true] %s115_s0 }
  0x15   :  { %s149_s19 = scalar_lea.vmem %s116_s0, 128  ;;  %p154_p9 = scmp.lt.s32.totalorder %s116_s0, %s116_s0 }
  0x16   :  { %p150_p8 = scmp.ne.s32.totalorder %s116_s0, %s149_s19  ;;  %p155_p10 = scmp.lt.s32.totalorder %s149_s19, %s149_s19 }
  0x17   :  { %95 = vmatmul.mubr.f32.vlgmr.msra.gmra.mrb[0].mxu0 %v27_v2 }
  0x18   :  { %p156_p11 = por %p155_p10, %p154_p9 }
  0x1a   :  { %v29_v3 = vld [vmem:[#allocation5] sm:$0xff]  ;;  %p157_p12 = pnand %p156_p11, %p150_p8 }
  0xea   :  { %v96_v4 = vpop.f32.mrb[0].mxu0 }
  0xeb   :  { %v100_v5 = vadd.f32 %v96_v4, %v29_v3  ;;  %v98_v6 = vpop.f32.mrb[1].mxu0 }
  0xed   :  { %102 = vst.msk [vmem:[#allocation5] sm:$0xff] %vm25_vm0, %v100_v5 }
  0xf4   :  { %v106_v7 = vld [vmem:[#allocation5] sm:$0xff] }
  0xf5   :  { %v107_v8 = vmul.f32 0.00048828125, %v106_v7 }
  0xf7   :  { %108 = vst.msk [vmem:[#allocation5] sm:$0xff] %vm25_vm0, %v107_v8 }
  0xf8   :  { %160 = shalt.err (!%p157_p12)
}
  0xf9   :  { %s161_s22 = scalar_lea.hbm %s216_s1, 128 }
  0xfa   :  { %p162_p13 = scmp.ne.s32.totalorder %s216_s1, %s161_s22  ;;  %p165_p0 = scmp.lt.u32.totalorder %s161_s22, %s216_s1 }
  0xfc   :  { %p167_p1 = pnand %p165_p0, %p162_p13 }
  0xfe   :  { %170 = shalt.err (!%p167_p1)
}
  0xff   :  { %118 = dma.vmem_to_hbm [thread:$0]  %s116_s0, 128, %s216_s1, [#allocation4]  }
 0x100   :  { %173 = dma.done.wait [#allocation4], 128  }
 0x101   :  { %174 = vsyncadd [#allocation4], 4294967168 }
 0x102   :  { %122 = vsyncpa [#allocation3], 1 }
 0x103   :  { %123 = vsyncpa [#allocation4], 1 }

</bundles_post_ra>
